<compile_context>
chip_gen: v7x
topology: tpu7x:2x2x1
jax: 0.10.0
libtpu: 0.0.40
codegen_flags: <defaults>
</compile_context>

<pallas_src>
import math

import jax
import jax.numpy as jnp
from jax.experimental import pallas as pl
from jax.experimental.pallas import tpu as pltpu


def _threshold_kernel(x_ref, t_ref, o_ref):
    # Hard thresholding: y = x where |x| > |T|, else 0.
    # Written as "|x| <= |T| -> 0, otherwise x" so NaNs in x propagate
    # (abs(NaN) <= t is False), matching the torch abs/relu/copysign pipeline.
    x = x_ref[...]                                  # (rt, lane_w), x.dtype
    t = t_ref[...]                                  # (1, lane_w), f32, bcast over rows
    xa = jnp.abs(x).astype(jnp.float32)             # compare in f32 (matches ref promotion)
    o_ref[...] = jnp.where(xa <= t, jnp.zeros_like(x), x)


def _round_up(a, b):
    return -(-a // b) * b


def _pick_fold(rows, feat, lane_cap=1024):
    """Smallest fold_k (multiple of lcm(feat,128)//feat) that divides `rows`
    and keeps lane_w <= lane_cap -> lane-dense layout with NO padding copy.
    Falls back to 1 (lane_w = feat) if none divides."""
    if feat % 128 == 0:
        return 1
    k0 = math.lcm(feat, 128) // feat
    k = k0
    while k * feat <= lane_cap:
        if rows % k == 0:
            return k
        k += k0
    return 1


def _device_tuning():
    """(target_block_bytes, min_grid_steps) from the attached TPU generation."""
    kind = ""
    try:
        kind = jax.devices()[0].device_kind.lower()
    except Exception:
        pass
    if "v7" in kind:
        # ~3.2 TB/s HBM per TC, 2 TCs/chip: bigger blocks, keep >=8 grid steps.
        return 4 * 1024 * 1024, 8
    if "v5" in kind:
        # 16 MiB default scoped VMEM; ~0.8 TB/s HBM saturates near 1 MiB blocks.
        return 3 * 512 * 1024, 1
    return 2 * 1024 * 1024, 1   # v6e / unknown


def thresholding(x, T, *, target_block_bytes=None):
    """Pallas forward of Thresholding (y = copysign(relu(|x|-|T|),x) + sign(.)*|T|)."""
    orig_shape = x.shape
    feat = int(T.shape[0])
    assert orig_shape[-1] == feat, "T broadcasts over the last axis of x"

    # |T| hoisted out of the kernel; kept in f32 so the threshold decision
    # matches the reference's promoted precision even for bf16 x.
    t_abs = jnp.abs(T).astype(jnp.float32)

    rows = 1
    for d in orig_shape[:-1]:
        rows *= int(d)

    # --- lane-dense layout (pure metadata reshape, no HBM copy) --------------
    fold_k = _pick_fold(rows, feat)
    lane_w = fold_k * feat
    Rf = rows // fold_k
    xf = x.reshape(Rf, lane_w)
    tf = jnp.tile(t_abs, fold_k).reshape(1, lane_w)

    # --- block sizing: by bytes, dtype-aware sublane, per-chip target --------
    itemsize = jnp.dtype(x.dtype).itemsize
    SUB = max(8, 32 // itemsize)                 # 8 (f32), 16 (bf16), 32 (int8/fp8)
    auto_bytes, min_steps = _device_tuning()
    blk_bytes = target_block_bytes or auto_bytes

    rt = max(SUB, (blk_bytes // (lane_w * itemsize)) // SUB * SUB)
    rt = min(rt, _round_up(Rf, SUB))             # never bigger than the whole array
    # Keep enough grid steps for v7x's 2 TensorCores when the array is large
    # enough; >=1 MiB blocks stay on the HBM roofline anyway.
    if min_steps > 1 and pl.cdiv(Rf, rt) < min_steps and Rf >= min_steps * SUB:
        rt = max(SUB, _round_up(pl.cdiv(Rf, min_steps), SUB))

    grid = (pl.cdiv(Rf, rt),)                    # partial last block masked: no pad copy

    n_elem = Rf * lane_w
    out = pl.pallas_call(
        _threshold_kernel,
        out_shape=jax.ShapeDtypeStruct((Rf, lane_w), x.dtype),
        grid=grid,
        in_specs=[
            pl.BlockSpec((rt, lane_w), lambda i: (i, 0)),
            pl.BlockSpec((1, lane_w), lambda i: (0, 0)),
        ],
        out_specs=pl.BlockSpec((rt, lane_w), lambda i: (i, 0)),
        compiler_params=pltpu.CompilerParams(
            dimension_semantics=("parallel",)),
        cost_estimate=pl.CostEstimate(
            flops=3 * n_elem,
            bytes_accessed=2 * n_elem * itemsize,
            transcendentals=0),
    )(xf, tf)

    return out.reshape(orig_shape)


def thresholding_ref(x, T):
    """Pure-JAX reference (mirrors the torch code 1:1)."""
    t_abs = jnp.abs(T)
    xs = jnp.copysign(jnp.maximum(jnp.abs(x) - t_abs, 0.0), x)
    return xs + jnp.sign(xs) * t_abs


if __name__ == "__main__":
    key = jax.random.PRNGKey(0)
    kx, kt, kx2, kt2 = jax.random.split(key, 4)

    # Primary shape: (B, C, H, W) with T over the last axis.
    B, C, H, W = 2, 4, 16, 16
    num_features = W

    x = jax.random.normal(kx, (B, C, H, W), dtype=jnp.float32)
    # torch.rand(num_features) / 10  -> uniform [0, 0.1)
    T = jax.random.uniform(kt, (num_features,), dtype=jnp.float32) / 10.0

    y = jax.block_until_ready(thresholding(x, T))
    y_ref = thresholding_ref(x, T)
    assert y.shape == x.shape and y.dtype == x.dtype
    assert jnp.allclose(y, y_ref, atol=1e-6, rtol=1e-6)

    # NaN propagation matches the torch pipeline.
    x_nan = x.at[0, 0, 0, 0].set(jnp.nan)
    y_nan = jax.block_until_ready(thresholding(x_nan, T))
    assert bool(jnp.isnan(y_nan[0, 0, 0, 0]))

    # Secondary shape: exercises the no-fold fallback + cdiv partial-block mask.
    x2 = jax.random.normal(kx2, (3, 5, 32), dtype=jnp.float32)
    T2 = jax.random.uniform(kt2, (32,), dtype=jnp.float32) / 10.0
    y2 = jax.block_until_ready(thresholding(x2, T2))
    assert jnp.allclose(y2, thresholding_ref(x2, T2), atol=1e-6, rtol=1e-6)

    print("KERNEL_OK")
</pallas_src>

<mosaic_0001>
module attributes {stable_mosaic.version = 11 : i64} {
  func.func @_threshold_kernel(%arg0: i32, %arg1: memref<16x128xf32, #tpu.memory_space<vmem>>, %arg2: memref<1x128xf32, #tpu.memory_space<vmem>>, %arg3: memref<16x128xf32, #tpu.memory_space<vmem>>) attributes {dimension_semantics = [#tpu.dimension_semantics<parallel>], iteration_bounds = array<i64: 1>, scalar_prefetch = 0 : i64, scratch_operands = 0 : i64, tpu.core_type = #tpu.core_type<tc>, window_params = [{transform_indices = @transform_0, window_bounds = array<i64: 16, 128>}, {pipeline_mode = #tpu.pipeline_mode<synchronous>, transform_indices = @transform_1, window_bounds = array<i64: 1, 128>}, {transform_indices = @transform_2, window_bounds = array<i64: 16, 128>}]} {
    %c0 = arith.constant 0 : index
    %c0_0 = arith.constant 0 : index
    %0 = vector.load %arg1[%c0, %c0_0] : memref<16x128xf32, #tpu.memory_space<vmem>>, vector<16x128xf32>
    %c0_1 = arith.constant 0 : index
    %c0_2 = arith.constant 0 : index
    %1 = vector.load %arg2[%c0_1, %c0_2] : memref<1x128xf32, #tpu.memory_space<vmem>>, vector<1x128xf32>
    %2 = math.absf %0 : vector<16x128xf32>
    %3 = vector.broadcast %1 : vector<1x128xf32> to vector<16x128xf32>
    %4 = arith.cmpf ole, %2, %3 : vector<16x128xf32>
    %cst = arith.constant 0.000000e+00 : f32
    %5 = vector.broadcast %cst : f32 to vector<16x128xf32>
    %6 = arith.select %4, %5, %0 : vector<16x128xi1>, vector<16x128xf32>
    %c0_3 = arith.constant 0 : index
    %c0_4 = arith.constant 0 : index
    %7 = vector.load %arg3[%c0_3, %c0_4] : memref<16x128xf32, #tpu.memory_space<vmem>>, vector<16x128xf32>
    tpu.vector_store %arg3[%c0_3, %c0_4], %6 {strides = array<i32>} : memref<16x128xf32, #tpu.memory_space<vmem>>, vector<16x128xf32>,
    return
  }
  func.func @transform_0(%arg0: i32) -> (i32, i32) {
    %c0_i32 = arith.constant 0 : i32
    %c0_i32_0 = arith.constant 0 : i32
    return %arg0, %c0_i32 : i32, i32
  }
  func.func @transform_1(%arg0: i32) -> (i32, i32) {
    %c0_i32 = arith.constant 0 : i32
    %c0_i32_0 = arith.constant 0 : i32
    %c0_i32_1 = arith.constant 0 : i32
    return %c0_i32, %c0_i32_0 : i32, i32
  }
  func.func @transform_2(%arg0: i32) -> (i32, i32) {
    %c0_i32 = arith.constant 0 : i32
    %c0_i32_0 = arith.constant 0 : i32
    return %arg0, %c0_i32 : i32, i32
  }
}

</mosaic_0001>

<bundles_post_ra>
// kernel: tpu_custom_call.1
= control target key start
LH: loop header
LB: loop body
LE: loop exit
PB: predicated region body
PF: predicated region fallthrough
CT: control target
= control target key end

     0   :  { %7 = vsyncpa [#allocation3], 0  ;;  %s165_s0 = inlined_call_operand.hbm [shape: f32[16,128], index: 0, kind: input, shape index: {}]   ;;  %s166_s1 = inlined_call_operand.vmem [shape: f32[1,128], index: 1, kind: input, shape index: {}]   ;;  %s167_s2 = inlined_call_operand.hbm [shape: f32[16,128], index: 2, kind: output, shape index: {}]  }
   0x1   :  { %8 = vsyncpa [#allocation4], 0  ;;  %s113_s9 = smov [#allocation2]   ;;  %s65_s13 = scalar_lea.hbm %s165_s0, 256 }
   0x2   :  { %s14_s10 = sshll.u32 %s113_s9, 4  ;;  %p66_p0 = scmp.ne.s32.totalorder %s165_s0, %s65_s13  ;;  %s15_s10 = int_to_ptr.vmem [resolvable:$true] %s14_s10 }
   0x3   :  { %p69_p1 = scmp.lt.u32.totalorder %s65_s13, %s165_s0 }
   0x5   :  { %p71_p2 = pnand %p69_p1, %p66_p0 }
   0x7   :  { %74 = shalt.err (!%p71_p2)
}
   0x8   :  { %s75_s18 = scalar_lea.vmem %s15_s10, 256  ;;  %p80_p4 = scmp.lt.s32.totalorder %s15_s10, %s15_s10 }
   0x9   :  { %p76_p3 = scmp.ne.s32.totalorder %s15_s10, %s75_s18  ;;  %p81_p5 = scmp.lt.s32.totalorder %s75_s18, %s75_s18 }
   0xb   :  { %p82_p6 = por %p81_p5, %p80_p4 }
   0xd   :  { %p83_p7 = pnand %p82_p6, %p76_p3 }
   0xf   :  { %86 = shalt.err (!%p83_p7)
}
  0x10   :  { %s114_s19 = smov 128   ;;  %s115_s20 = smov 8  }
  0x11   :  { %20 = dma.hbm_to_vmem [thread:$0]  %s165_s0, 256, %s15_s10, [#allocation3], %s114_s19, %s114_s19, %s115_s20  }
  0x12   :  { %109 = dma.done.wait [#allocation3], 256  }
  0x13   :  { %110 = vsyncadd [#allocation3], 4294967040  ;;  %v26_v0 = vld [vmem:[#allocation2] sm:$0xff]  ;;  %v27_v2 = vld [vmem:[#allocation2 + $0x8] sm:$0xff]  ;;  %s116_s25 = smov [#allocation5]  }
  0x14   :  { %v60_v1 = vld [vmem:[%s166_s1] ss:$0 sm:$0xff]  ;;  %s48_s26 = sshll.u32 %s116_s25, 4  ;;  %v29_v3 = vand.u32 2147483647, %v26_v0  ;;  %s49_s26 = int_to_ptr.vmem [resolvable:$true] %s48_s26 }
  0x15   :  { %v30_v4 = vand.u32 2147483647, %v27_v2  ;;  %s87_s0 = scalar_lea.vmem %s49_s26, 256  ;;  %p92_p9 = scmp.lt.s32.totalorder %s49_s26, %s49_s26 }
  0x16   :  { %vm37_vm0 = vcmp.le.f32.partialorder %v29_v3, %v60_v1  ;;  %p88_p8 = scmp.ne.s32.totalorder %s49_s26, %s87_s0  ;;  %p93_p10 = scmp.lt.s32.totalorder %s87_s0, %s87_s0 }
  0x17   :  { %vm38_vm1 = vcmp.le.f32.partialorder %v30_v4, %v60_v1  ;;  %v39_v5 = vsel %vm37_vm0, 0.0, %v26_v0 }
  0x18   :  { %v40_v6 = vsel %vm38_vm1, 0.0, %v27_v2  ;;  %41 = vst [vmem:[#allocation5] sm:$0xff] %v39_v5  ;;  %p94_p11 = por %p93_p10, %p92_p9 }
  0x19   :  { %42 = vst [vmem:[#allocation5 + $0x8] sm:$0xff] %v40_v6 }
  0x1a   :  { %p95_p12 = pnand %p94_p11, %p88_p8 }
  0x1c   :  { %98 = shalt.err (!%p95_p12)
}
  0x1d   :  { %s99_s28 = scalar_lea.hbm %s167_s2, 256 }
  0x1e   :  { %p100_p13 = scmp.ne.s32.totalorder %s167_s2, %s99_s28  ;;  %p103_p0 = scmp.lt.u32.totalorder %s99_s28, %s167_s2 }
  0x20   :  { %p105_p1 = pnand %p103_p0, %p100_p13 }
  0x22   :  { %108 = shalt.err (!%p105_p1)
}
  0x23   :  { %54 = dma.vmem_to_hbm [thread:$0]  %s49_s26, 256, %s167_s2, [#allocation4], %s114_s19, %s114_s19, %s115_s20  }
  0x24   :  { %111 = dma.done.wait [#allocation4], 256  }
  0x25   :  { %112 = vsyncadd [#allocation4], 4294967040 }
  0x26   :  { %58 = vsyncpa [#allocation3], 1 }
  0x27   :  { %59 = vsyncpa [#allocation4], 1 }

</bundles_post_ra>
